<compile_context>
chip_gen: v7x
topology: tpu7x:2x2x1
jax: 0.10.0
libtpu: 0.0.40
codegen_flags: <defaults>
</compile_context>

<pallas_src>
import jax
import jax.numpy as jnp
import numpy as np
from jax.experimental import pallas as pl
from jax.experimental.pallas import tpu as pltpu


# ----------------------------- Pallas kernel -------------------------------

def hinge_kernel(bfc_ref, p_ref, w_ref, shift_ref, wfc_ref, g_ref, out_ref):
    F_ = wfc_ref.shape[1]            # num_filters
    Fv = shift_ref.shape[1]          # (1 + K) * F
    nv = Fv // F_                    # number of views (1 + K)

    # Fused conv1 + all conv2 views: one MXU matmul, lane-concatenated outputs.
    # (tb*Ej, P) @ (P, (1+K)*F) -> (tb*Ej, (1+K)*F)
    y = jnp.dot(p_ref[...], w_ref[...], preferred_element_type=jnp.float32)
    # Folded BN/conv-bias shift + ReLU (BN scale already folded into w_ref).
    y = jnp.maximum(y + shift_ref[...], 0.0)

    # Min over the (1+K) views (static lane slices).
    m = y[:, 0:F_]
    for v in range(1, nv):
        m = jnp.minimum(m, y[:, v * F_:(v + 1) * F_])

    # Final Linear(F*Ej, 1): elementwise fc weight, then group row-sum per
    # batch element via a tiny selector matmul (MXU), then a short lane reduce.
    weighted = m * wfc_ref[...]                                        # (tb*Ej, F)
    per_b = jnp.dot(g_ref[...], weighted,
                    preferred_element_type=jnp.float32)                # (tb, F)
    score = jnp.sum(per_b, axis=-1)                                    # (tb,)
    out_ref[...] = score[None, :] + bfc_ref[0]                         # (1, tb)


def hinge_pallas(patches_cat, wcat, shift, wfc_jf, bfc, *, tb=None):
    N, Pc = patches_cat.shape            # N = B * Ej
    Fv = wcat.shape[1]                   # (1 + K) * F
    Ej, F_ = wfc_jf.shape
    B = N // Ej
    if tb is None:
        tb = B                           # single grid step for small batches
    assert B % tb == 0
    n_steps = B // tb
    grid = (n_steps,)

    # Per-tile constants (fc weight tiled over the tile's batch rows, and a
    # 0/1 selector that sums each group of Ej rows).
    wfc_tiled = jnp.tile(wfc_jf, (tb, 1)).astype(jnp.float32)          # (tb*Ej, F)
    gsel = jnp.kron(jnp.eye(tb, dtype=jnp.float32),
                    jnp.ones((1, Ej), jnp.float32))                    # (tb, tb*Ej)
    bfc_arr = jnp.reshape(bfc, (1,)).astype(jnp.float32)               # SMEM scalar

    out = pl.pallas_call(
        hinge_kernel,
        out_shape=jax.ShapeDtypeStruct((n_steps, tb), jnp.float32),
        grid_spec=pltpu.PrefetchScalarGridSpec(
            num_scalar_prefetch=0,
            grid=grid,
            in_specs=[
                pl.BlockSpec(memory_space=pltpu.MemorySpace.SMEM),      # bfc
                pl.BlockSpec((tb * Ej, Pc), lambda i: (i, 0)),          # patches
                pl.BlockSpec((Pc, Fv), lambda i: (0, 0)),               # wcat
                pl.BlockSpec((1, Fv), lambda i: (0, 0)),                # shift
                pl.BlockSpec((tb * Ej, F_), lambda i: (0, 0)),          # wfc tiled
                pl.BlockSpec((tb, tb * Ej), lambda i: (0, 0)),          # selector
            ],
            out_specs=pl.BlockSpec((1, tb), lambda i: (i, 0)),
        ),
        compiler_params=pltpu.CompilerParams(
            dimension_semantics=("parallel",)),
    )(bfc_arr, patches_cat, wcat, shift, wfc_tiled, gsel)
    return out.reshape(B, 1)


# ------------------------------ JAX glue ------------------------------------

def make_patches(rows, kh):
    """rows: (B, kh, E) -> im2col patches (B, E-2, kh*3), patch order (r, c)."""
    Ej = rows.shape[-1] - 2
    cols = [rows[:, r, c:c + Ej] for r in range(kh) for c in range(3)]
    return jnp.stack(cols, axis=-1)


def hinge_forward(x_batch, arity, params, *, tb=None):
    """Full HINGE forward: embedding lookups + patch build (glue) + Pallas kernel."""
    (emb_keys, emb_vals, W1, b1c, W2, b2c,
     g1, be1, mu1, var1, g2, be2, mu2, var2, Wfc, bfc) = params
    eps = 1e-5
    B = x_batch.shape[0]
    E = emb_keys.shape[1]
    Ej = E - 2
    F_ = W1.shape[0]
    K = arity - 2
    assert K >= 1  # this script exercises the arity > 2 path

    key_ids = x_batch[:, 0::2]
    val_ids = x_batch[:, 1::2]
    fk = jnp.take(emb_keys, key_ids[:, :2], axis=0)    # (B, 2, E)
    fv = jnp.take(emb_vals, val_ids[:, :2], axis=0)    # (B, 2, E)
    kvk = jnp.take(emb_keys, key_ids[:, 2:], axis=0)   # (B, K, E)
    kvv = jnp.take(emb_vals, val_ids[:, 2:], axis=0)   # (B, K, E)

    hrt = jnp.stack([fv[:, 0], fk[:, 0], fv[:, 1]], axis=1)        # (B, 3, E)
    patches1 = make_patches(hrt, 3)                                # (B, Ej, 9)
    p2_list = []
    for k in range(K):
        rows5 = jnp.concatenate(
            [hrt, kvk[:, k:k + 1], kvv[:, k:k + 1]], axis=1)       # (B, 5, E)
        p2_list.append(make_patches(rows5, 5))                     # (B, Ej, 15)

    # Lane-concatenate the views' patches and flatten batch*column rows.
    Pc = 9 + 15 * K
    patches_cat = jnp.concatenate([patches1] + p2_list, axis=-1)   # (B, Ej, Pc)
    patches_cat = patches_cat.reshape(B * Ej, Pc).astype(jnp.float32)

    # Fold BatchNorm (inference mode, running stats) + conv bias:
    #   scale a = g / sqrt(var + eps)  -> folded into conv weights
    #   shift c = beta + a * (conv_bias - mu)
    a1 = g1 / jnp.sqrt(var1 + eps)
    c1 = be1 + a1 * (b1c - mu1)
    a2 = g2 / jnp.sqrt(var2 + eps)
    c2 = be2 + a2 * (b2c - mu2)

    # Conv weights as (patch, F) with BN scale folded in; block-diagonal fuse.
    w1s = (W1.reshape(F_, 9).T * a1[None, :]).astype(jnp.float32)      # (9, F)
    w2s = (W2.reshape(F_, 15).T * a2[None, :]).astype(jnp.float32)     # (15, F)
    Fv = (1 + K) * F_
    wcat = jnp.zeros((Pc, Fv), jnp.float32)
    wcat = wcat.at[0:9, 0:F_].set(w1s)
    for k in range(K):
        wcat = wcat.at[9 + 15 * k:9 + 15 * (k + 1),
                       (1 + k) * F_:(2 + k) * F_].set(w2s)

    # Per-lane shift: [c1 | c2 | c2 | ...]
    shift = jnp.concatenate([c1] + [c2] * K).reshape(1, Fv).astype(jnp.float32)

    # Linear weight (1, F*Ej) -> (Ej, F) so wfc[j, f] == Wfc[0, f*Ej + j]
    wfc_jf = Wfc.reshape(F_, Ej).T.astype(jnp.float32)

    return hinge_pallas(patches_cat, wcat, shift, wfc_jf, bfc, tb=tb)


# --------------------------- pure-JAX reference ------------------------------

def hinge_reference(x_batch, arity, params):
    (emb_keys, emb_vals, W1, b1c, W2, b2c,
     g1, be1, mu1, var1, g2, be2, mu2, var2, Wfc, bfc) = params
    eps = 1e-5
    B = x_batch.shape[0]

    key_ids = x_batch[:, 0::2]
    val_ids = x_batch[:, 1::2]
    fk = jnp.take(emb_keys, key_ids[:, :2], axis=0)
    fv = jnp.take(emb_vals, val_ids[:, :2], axis=0)
    kvk = jnp.take(emb_keys, key_ids[:, 2:], axis=0)
    kvv = jnp.take(emb_vals, val_ids[:, 2:], axis=0)
    hrt = jnp.stack([fv[:, 0], fk[:, 0], fv[:, 1]], axis=1)

    def conv_bn_relu(rows, W, bconv, gamma, beta, mean, var):
        y = jax.lax.conv_general_dilated(
            rows[:, None, :, :], W, (1, 1), 'VALID',
            dimension_numbers=('NCHW', 'OIHW', 'NCHW'))
        y = y + bconv[None, :, None, None]
        y = gamma[None, :, None, None] * (y - mean[None, :, None, None]) \
            / jnp.sqrt(var[None, :, None, None] + eps) + beta[None, :, None, None]
        y = jnp.maximum(y, 0.0)               # (B, F, 1, Ej)
        return y.reshape(B, -1)               # (B, F*Ej)  (PyTorch .view order)

    views = [conv_bn_relu(hrt, W1, b1c, g1, be1, mu1, var1)]
    for k in range(arity - 2):
        rows5 = jnp.concatenate([hrt, kvk[:, k:k + 1], kvv[:, k:k + 1]], axis=1)
        views.append(conv_bn_relu(rows5, W2, b2c, g2, be2, mu2, var2))
    m = jnp.min(jnp.stack(views, axis=-1), axis=-1)   # (B, F*Ej)
    return m @ Wfc.T + bfc


# --------------------------------- main --------------------------------------

if __name__ == "__main__":
    B, arity, E, F_ = 16, 3, 16, 32
    n_rel_keys, num_values = 11, 17
    Ej = E - 2

    root = jax.random.PRNGKey(0)
    ks = jax.random.split(root, 10)

    bound = float(np.sqrt(1.0 / E))
    emb_keys = jax.random.uniform(ks[0], (n_rel_keys, E), jnp.float32, -bound, bound)
    emb_keys = emb_keys.at[0].set(0.0)                      # padding_idx = 0
    emb_vals = jax.random.uniform(ks[1], (num_values, E), jnp.float32, -bound, bound)
    emb_vals = emb_vals.at[0].set(0.0)

    W1 = 0.1 * jax.random.truncated_normal(ks[2], -2.0, 2.0, (F_, 1, 3, 3), jnp.float32)
    b1c = jnp.zeros((F_,), jnp.float32)
    W2 = 0.1 * jax.random.truncated_normal(ks[3], -2.0, 2.0, (F_, 1, 5, 3), jnp.float32)
    b2c = jnp.zeros((F_,), jnp.float32)

    # BatchNorm params (PyTorch defaults), inference / running-stats mode.
    g1, be1 = jnp.ones((F_,), jnp.float32), jnp.zeros((F_,), jnp.float32)
    mu1, var1 = jnp.zeros((F_,), jnp.float32), jnp.ones((F_,), jnp.float32)
    g2, be2 = jnp.ones((F_,), jnp.float32), jnp.zeros((F_,), jnp.float32)
    mu2, var2 = jnp.zeros((F_,), jnp.float32), jnp.ones((F_,), jnp.float32)

    fc_in = F_ * Ej
    xavier_std = float(np.sqrt(2.0 / (fc_in + 1)))
    Wfc = xavier_std * jax.random.normal(ks[4], (1, fc_in), jnp.float32)
    bfc = jnp.zeros((1,), jnp.float32)

    params = (emb_keys, emb_vals, W1, b1c, W2, b2c,
              g1, be1, mu1, var1, g2, be2, mu2, var2, Wfc, bfc)

    # x_batch: (B, 2*arity) = interleaved [key0, val0, key1, val1, key2, val2]
    key_ids = jax.random.randint(ks[5], (B, arity), 1, n_rel_keys, jnp.int32)
    val_ids = jax.random.randint(ks[6], (B, arity), 1, num_values, jnp.int32)
    x_batch = jnp.stack([key_ids, val_ids], axis=2).reshape(B, 2 * arity)

    out = hinge_forward(x_batch, arity, params)
    out = jax.block_until_ready(out)

    ref = hinge_reference(x_batch, arity, params)
    ref = jax.block_until_ready(ref)

    assert out.shape == (B, 1)
    np.testing.assert_allclose(np.asarray(out), np.asarray(ref), rtol=1e-4, atol=1e-4)
    print("KERNEL_OK")
</pallas_src>

<mosaic_0001>
module attributes {stable_mosaic.version = 11 : i64} {
  func.func @hinge_kernel(%arg0: i32, %arg1: memref<1xf32, #tpu.memory_space<smem>>, %arg2: memref<224x24xf32, #tpu.memory_space<vmem>>, %arg3: memref<24x64xf32, #tpu.memory_space<vmem>>, %arg4: memref<1x64xf32, #tpu.memory_space<vmem>>, %arg5: memref<224x32xf32, #tpu.memory_space<vmem>>, %arg6: memref<16x224xf32, #tpu.memory_space<vmem>>, %arg7: memref<1x16xf32, #tpu.memory_space<vmem>>) attributes {dimension_semantics = [#tpu.dimension_semantics<parallel>], iteration_bounds = array<i64: 1>, scalar_prefetch = 0 : i64, scratch_operands = 0 : i64, tpu.core_type = #tpu.core_type<tc>, window_params = [{transform_indices = @transform_0, window_bounds = array<i64: 1>}, {transform_indices = @transform_1, window_bounds = array<i64: 224, 24>}, {pipeline_mode = #tpu.pipeline_mode<synchronous>, transform_indices = @transform_2, window_bounds = array<i64: 24, 64>}, {pipeline_mode = #tpu.pipeline_mode<synchronous>, transform_indices = @transform_3, window_bounds = array<i64: 1, 64>}, {pipeline_mode = #tpu.pipeline_mode<synchronous>, transform_indices = @transform_4, window_bounds = array<i64: 224, 32>}, {pipeline_mode = #tpu.pipeline_mode<synchronous>, transform_indices = @transform_5, window_bounds = array<i64: 16, 224>}, {transform_indices = @transform_6, window_bounds = array<i64: 1, 16>}]} {
    %c0 = arith.constant 0 : index
    %c0_0 = arith.constant 0 : index
    %0 = vector.load %arg2[%c0, %c0_0] : memref<224x24xf32, #tpu.memory_space<vmem>>, vector<224x24xf32>
    %c0_1 = arith.constant 0 : index
    %c0_2 = arith.constant 0 : index
    %1 = vector.load %arg3[%c0_1, %c0_2] : memref<24x64xf32, #tpu.memory_space<vmem>>, vector<24x64xf32>
    %cst = arith.constant dense<0.000000e+00> : vector<224x64xf32>
    %2 = tpu.matmul %0, %1, %cst {dimension_numbers = #tpu.dot_dimension_numbers<[1], [0], [0], [1], [0, 0, 1, 1], [], []>} : vector<224x24xf32>, vector<24x64xf32>, vector<224x64xf32> -> vector<224x64xf32>
    %c0_3 = arith.constant 0 : index
    %c0_4 = arith.constant 0 : index
    %3 = vector.load %arg4[%c0_3, %c0_4] : memref<1x64xf32, #tpu.memory_space<vmem>>, vector<1x64xf32>
    %4 = vector.broadcast %3 : vector<1x64xf32> to vector<224x64xf32>
    %5 = arith.addf %2, %4 : vector<224x64xf32>
    %cst_5 = arith.constant 0.000000e+00 : f32
    %6 = vector.broadcast %cst_5 : f32 to vector<224x64xf32>
    %7 = arith.maximumf %5, %6 : vector<224x64xf32>
    %8 = vector.extract_strided_slice %7 {offsets = [0, 0], sizes = [224, 32], strides = [1, 1]} : vector<224x64xf32> to vector<224x32xf32>
    %9 = vector.extract_strided_slice %7 {offsets = [0, 32], sizes = [224, 32], strides = [1, 1]} : vector<224x64xf32> to vector<224x32xf32>
    %10 = arith.minimumf %8, %9 : vector<224x32xf32>
    %c0_6 = arith.constant 0 : index
    %c0_7 = arith.constant 0 : index
    %11 = vector.load %arg5[%c0_6, %c0_7] : memref<224x32xf32, #tpu.memory_space<vmem>>, vector<224x32xf32>
    %12 = arith.mulf %10, %11 : vector<224x32xf32>
    %c0_8 = arith.constant 0 : index
    %c0_9 = arith.constant 0 : index
    %13 = vector.load %arg6[%c0_8, %c0_9] : memref<16x224xf32, #tpu.memory_space<vmem>>, vector<16x224xf32>
    %cst_10 = arith.constant dense<0.000000e+00> : vector<16x32xf32>
    %14 = tpu.matmul %13, %12, %cst_10 {dimension_numbers = #tpu.dot_dimension_numbers<[1], [0], [0], [1], [0, 0, 1, 1], [], []>} : vector<16x224xf32>, vector<224x32xf32>, vector<16x32xf32> -> vector<16x32xf32>
    %cst_11 = arith.constant dense<0.000000e+00> : vector<16xf32>
    %15 = vector.multi_reduction <add>, %14, %cst_11 [1] : vector<16x32xf32> to vector<16xf32>
    %16 = vector.shape_cast %15 : vector<16xf32> to vector<1x16xf32>
    %c0_12 = arith.constant 0 : index
    %17 = memref.load %arg1[%c0_12] : memref<1xf32, #tpu.memory_space<smem>>
    %18 = vector.broadcast %17 : f32 to vector<1x16xf32>
    %19 = arith.addf %16, %18 : vector<1x16xf32>
    %c0_13 = arith.constant 0 : index
    %c0_14 = arith.constant 0 : index
    %20 = vector.load %arg7[%c0_13, %c0_14] : memref<1x16xf32, #tpu.memory_space<vmem>>, vector<1x16xf32>
    tpu.vector_store %arg7[%c0_13, %c0_14], %19 {strides = array<i32>} : memref<1x16xf32, #tpu.memory_space<vmem>>, vector<1x16xf32>,
    return
  }
  func.func @transform_0(%arg0: i32) -> i32 {
    %c0_i32 = arith.constant 0 : i32
    %c0_i32_0 = arith.constant 0 : i32
    return %c0_i32 : i32
  }
  func.func @transform_1(%arg0: i32) -> (i32, i32) {
    %c0_i32 = arith.constant 0 : i32
    %c0_i32_0 = arith.constant 0 : i32
    return %arg0, %c0_i32 : i32, i32
  }
  func.func @transform_2(%arg0: i32) -> (i32, i32) {
    %c0_i32 = arith.constant 0 : i32
    %c0_i32_0 = arith.constant 0 : i32
    %c0_i32_1 = arith.constant 0 : i32
    return %c0_i32, %c0_i32_0 : i32, i32
  }
  func.func @transform_3(%arg0: i32) -> (i32, i32) {
    %c0_i32 = arith.constant 0 : i32
    %c0_i32_0 = arith.constant 0 : i32
    %c0_i32_1 = arith.constant 0 : i32
    return %c0_i32, %c0_i32_0 : i32, i32
  }
  func.func @transform_4(%arg0: i32) -> (i32, i32) {
    %c0_i32 = arith.constant 0 : i32
    %c0_i32_0 = arith.constant 0 : i32
    %c0_i32_1 = arith.constant 0 : i32
    return %c0_i32, %c0_i32_0 : i32, i32
  }
  func.func @transform_5(%arg0: i32) -> (i32, i32) {
    %c0_i32 = arith.constant 0 : i32
    %c0_i32_0 = arith.constant 0 : i32
    %c0_i32_1 = arith.constant 0 : i32
    return %c0_i32, %c0_i32_0 : i32, i32
  }
  func.func @transform_6(%arg0: i32) -> (i32, i32) {
    %c0_i32 = arith.constant 0 : i32
    %c0_i32_0 = arith.constant 0 : i32
    return %arg0, %c0_i32 : i32, i32
  }
}

</mosaic_0001>

<bundles_post_ra>
// kernel: tpu_custom_call.1
= control target key start
LH: loop header
LB: loop body
LE: loop exit
PB: predicated region body
PF: predicated region fallthrough
CT: control target
= control target key end

     0   :  { %vm63_vm0 = vcmask 195584   ;;  %s1432_s0 = inlined_call_operand.<no memory space> [shape: f32[1], index: 0, kind: input, shape index: {}]   ;;  %s1433_s1 = inlined_call_operand.vmem [shape: f32[224,24], index: 1, kind: input, shape index: {}]   ;;  %s1434_s2 = inlined_call_operand.vmem [shape: f32[24,64], index: 2, kind: input, shape index: {}]   ;;  %s1435_s3 = inlined_call_operand.vmem [shape: f32[1,64], index: 3, kind: input, shape index: {}]   ;;  %s1436_s4 = inlined_call_operand.vmem [shape: f32[224,32], index: 4, kind: input, shape index: {}]   ;;  %s1437_s5 = inlined_call_operand.vmem [shape: f32[16,224], index: 5, kind: input, shape index: {}]   ;;  %s1438_s6 = inlined_call_operand.hbm [shape: f32[1,16], index: 6, kind: output, shape index: {}]  }
   0x1   :  { %v53_v0 = vld [vmem:[%s1434_s2] sm:$0xff]  ;;  %v54_v1 = vld [vmem:[%s1434_s2 + $0x8] sm:$0xff]  ;;  %v55_v4 = vld [vmem:[%s1434_s2 + $0x10] sm:$0xff] }
   0x2   :  { %v816_v2 = vpack.c.bf16 %v54_v1, %v53_v0  ;;  %v25_v3 = vld [vmem:[%s1433_s1] sm:$0xff]  ;;  %v26_v5 = vld [vmem:[%s1433_s1 + $0x8] sm:$0xff]  ;;  %v27_v6 = vld [vmem:[%s1433_s1 + $0x10] sm:$0xff] }
   0x3   :  { %774 = vmatprep.mubr.msk.f32.mxu0 %vm63_vm0, %v25_v3  ;;  %v28_v7 = vld [vmem:[%s1433_s1 + $0x18] sm:$0xff] }
   0x4   :  { %817 = vmatprep.subr.bf16.mxu0 %v816_v2 }
   0x5   :  { %819 = vmatpush3.bf16.msra.mxu0 %v816_v2 }
   0x6   :  { %772 = vmatprep.subr.mxu0 %v55_v4 }
   0x9   :  { %773 = vmatpush3.msra.mxu0 %v55_v4 }
   0xa   :  { %775 = vmatmul.mubr.msk.f32.vlgmr.msra.gmra.mrb[0].mxu0 %vm63_vm0, %v26_v5 }
   0xb   :  { %777 = vmatprep.mubr.msk.f32.mxu0 %vm63_vm0, %v27_v6 }
   0xc   :  { %12 = vsyncpa [#allocation4], 0  ;;  %v29_v8 = vld [vmem:[%s1433_s1 + $0x20] sm:$0xff]  ;;  %v30_v9 = vld [vmem:[%s1433_s1 + $0x28] sm:$0xff]  ;;  %v889_v36 = vmov 0.0|0.0   ;;  %vm581_vm1 = vcmask 785408  }
   0xd   :  { %v31_v10 = vld [vmem:[%s1433_s1 + $0x30] sm:$0xff]  ;;  %v32_v11 = vld [vmem:[%s1433_s1 + $0x38] sm:$0xff]  ;;  %v33_v12 = vld [vmem:[%s1433_s1 + $0x40] sm:$0xff]  ;;  %820 = vmatprep.subr.bf16.mxu1 %v889_v36  ;;  %vm663_vm2 = vcmask 261120   ;;  %vm687_vm3 = vcmask 130112   ;;  %vm690_vm4 = vcmask 122880  }
   0xe   :  { %778 = vmatmul.mubr.msk.f32.gmra.mrb[2].mxu0 %vm63_vm0, %v28_v7  ;;  %v34_v13 = vld [vmem:[%s1433_s1 + $0x48] sm:$0xff]  ;;  %v35_v14 = vld [vmem:[%s1433_s1 + $0x50] sm:$0xff]  ;;  %v36_v15 = vld [vmem:[%s1433_s1 + $0x58] sm:$0xff] }
   0xf   :  { %780 = vmatprep.mubr.msk.f32.mxu0 %vm63_vm0, %v29_v8  ;;  %v37_v16 = vld [vmem:[%s1433_s1 + $0x60] sm:$0xff]  ;;  %v38_v17 = vld [vmem:[%s1433_s1 + $0x68] sm:$0xff]  ;;  %v39_v18 = vld [vmem:[%s1433_s1 + $0x70] sm:$0xff] }
  0x10   :  { %v40_v19 = vld [vmem:[%s1433_s1 + $0x78] sm:$0xff]  ;;  %v41_v20 = vld [vmem:[%s1433_s1 + $0x80] sm:$0xff]  ;;  %v42_v21 = vld [vmem:[%s1433_s1 + $0x88] sm:$0xff] }
  0x11   :  { %v43_v22 = vld [vmem:[%s1433_s1 + $0x90] sm:$0xff]  ;;  %v44_v23 = vld [vmem:[%s1433_s1 + $0x98] sm:$0xff]  ;;  %v45_v24 = vld [vmem:[%s1433_s1 + $0xa0] sm:$0xff] }
  0x12   :  { %781 = vmatmul.mubr.msk.f32.gmra.mrb[4].mxu0 %vm63_vm0, %v30_v9  ;;  %v46_v25 = vld [vmem:[%s1433_s1 + $0xa8] sm:$0xff]  ;;  %v47_v26 = vld [vmem:[%s1433_s1 + $0xb0] sm:$0xff]  ;;  %v48_v27 = vld [vmem:[%s1433_s1 + $0xb8] sm:$0xff] }
  0x13   :  { %783 = vmatprep.mubr.msk.f32.mxu0 %vm63_vm0, %v31_v10  ;;  %v49_v28 = vld [vmem:[%s1433_s1 + $0xc0] sm:$0xff]  ;;  %v50_v29 = vld [vmem:[%s1433_s1 + $0xc8] sm:$0xff]  ;;  %v51_v30 = vld [vmem:[%s1433_s1 + $0xd0] sm:$0xff] }
  0x14   :  { %v52_v31 = vld [vmem:[%s1433_s1 + $0xd8] sm:$0xff]  ;;  %v1051_v32 = vld [vmem:[%s1435_s3] ss:$0 sm:$0xff]  ;;  %s890_s1 = smov 96  }
  0x16   :  { %784 = vmatmul.mubr.msk.f32.gmra.mrb[6].mxu0 %vm63_vm0, %v32_v11 }
  0x17   :  { %786 = vmatprep.mubr.msk.f32.mxu0 %vm63_vm0, %v33_v12 }
  0x1a   :  { %787 = vmatmul.mubr.msk.f32.gmra.mrb[8].mxu0 %vm63_vm0, %v34_v13 }
  0x1b   :  { %789 = vmatprep.mubr.msk.f32.mxu0 %vm63_vm0, %v35_v14 }
  0x1e   :  { %790 = vmatmul.mubr.msk.f32.gmra.mrb[10].mxu0 %vm63_vm0, %v36_v15 }
  0x1f   :  { %792 = vmatprep.mubr.msk.f32.mxu0 %vm63_vm0, %v37_v16 }
  0x22   :  { %793 = vmatmul.mubr.msk.f32.gmra.mrb[12].mxu0 %vm63_vm0, %v38_v17 }
  0x23   :  { %795 = vmatprep.mubr.msk.f32.mxu0 %vm63_vm0, %v39_v18 }
  0x26   :  { %796 = vmatmul.mubr.msk.f32.gmra.mrb[14].mxu0 %vm63_vm0, %v40_v19 }
  0x27   :  { %798 = vmatprep.mubr.msk.f32.mxu0 %vm63_vm0, %v41_v20 }
  0x2a   :  { %799 = vmatmul.mubr.msk.f32.gmra.mrb[16].mxu0 %vm63_vm0, %v42_v21 }
  0x2b   :  { %801 = vmatprep.mubr.msk.f32.mxu0 %vm63_vm0, %v43_v22 }
  0x2e   :  { %802 = vmatmul.mubr.msk.f32.gmra.mrb[18].mxu0 %vm63_vm0, %v44_v23 }
  0x2f   :  { %804 = vmatprep.mubr.msk.f32.mxu0 %vm63_vm0, %v45_v24 }
  0x32   :  { %805 = vmatmul.mubr.msk.f32.gmra.mrb[20].mxu0 %vm63_vm0, %v46_v25 }
  0x33   :  { %807 = vmatprep.mubr.msk.f32.mxu0 %vm63_vm0, %v47_v26 }
  0x36   :  { %808 = vmatmul.mubr.msk.f32.gmra.mrb[22].mxu0 %vm63_vm0, %v48_v27 }
  0x37   :  { %810 = vmatprep.mubr.msk.f32.mxu0 %vm63_vm0, %v49_v28 }
  0x3a   :  { %811 = vmatmul.mubr.msk.f32.gmra.mrb[24].mxu0 %vm63_vm0, %v50_v29 }
  0x3b   :  { %813 = vmatprep.mubr.msk.f32.mxu0 %vm63_vm0, %v51_v30 }
  0x3e   :  { %814 = vmatmul.mubr.msk.f32.gmra.mrb[26].mxu0 %vm63_vm0, %v52_v31 }
  0xdd   :  { %v776_v33 = vpop.f32.mrb[0].mxu0 }
  0xde   :  { %v214_v34 = vpop.f32.mrb[1].mxu0  ;;  %v1058_v37 = vadd.f32 %v776_v33, %v1051_v32 }
  0xdf   :  { %v1054_v35 = vadd.f32 %v1051_v32, %v214_v34 }
  0xe0   :  { %v354_v44 = vmax.f32 %v1058_v37, 0.0 }
  0xe1   :  { %v353_v38 = vmax.f32 %v1054_v35, 0.0  ;;  %v779_v39 = vpop.f32.mrb[2].mxu0  ;;  %v524_v35 = vld [vmem:[%s1436_s4 + $0x18] sm:$0xff] }
  0xe2   :  { %v1062_v40 = vadd.f32 %v779_v39, %v1051_v32  ;;  %v224_v41 = vpop.f32.mrb[3].mxu0 }
  0xe3   :  { %409 = vrot.lane.b32.xlu0 %v353_v38, %s890_s1  ;;  %v1069_v43 = vadd.f32 %v1051_v32, %v224_v41 }
  0xe4   :  { %v356_v42 = vmax.f32 %v1062_v40, 0.0 }
  0xe5   :  { %v782_v45 = vpop.f32.mrb[4].mxu0  ;;  %v355_v49 = vmax.f32 %v1069_v43, 0.0 }
  0xe6   :  { %v1073_v46 = vadd.f32 %v782_v45, %v1051_v32  ;;  %415 = vrot.lane.b32.xlu1 %v356_v42, %s890_s1  ;;  %v234_v47 = vpop.f32.mrb[5].mxu0 }
  0xe7   :  { %v1079_v48 = vadd.f32 %v1051_v32, %v234_v47  ;;  %411 = vrot.lane.b32.xlu0 %v354_v44, %s890_s1 }
  0xe8   :  { %v358_v52 = vmax.f32 %v1073_v46, 0.0 }
  0xe9   :  { %v357_v50 = vmax.f32 %v1079_v48, 0.0  ;;  %v785_v51 = vpop.f32.mrb[6].mxu0 }
  0xea   :  { %v1088_v53 = vadd.f32 %v785_v51, %v1051_v32  ;;  %v244_v54 = vpop.f32.mrb[7].mxu0  ;;  %413 = vrot.lane.b32.xlu1 %v355_v49, %s890_s1 }
  0xeb   :  { %v1094_v55 = vadd.f32 %v1051_v32, %v244_v54  ;;  %417 = vrot.lane.b32.xlu0 %v357_v50, %s890_s1 }
  0xec   :  { %v360_v58 = vmax.f32 %v1088_v53, 0.0 }
  0xed   :  { %v359_v56 = vmax.f32 %v1094_v55, 0.0  ;;  %v788_v57 = vpop.f32.mrb[8].mxu0 }
  0xee   :  { %v1102_v59 = vadd.f32 %v788_v57, %v1051_v32  ;;  %v254_v60 = vpop.f32.mrb[9].mxu0  ;;  %419 = vrot.lane.b32.xlu1 %v358_v52, %s890_s1 }
  0xef   :  { %v1108_v61 = vadd.f32 %v1051_v32, %v254_v60  ;;  %421 = vrot.lane.b32.xlu0 %v359_v56, %s890_s1 }
  0xf0   :  { %v362_v0 = vmax.f32 %v1102_v59, 0.0 }
  0xf1   :  { %v361_v62 = vmax.f32 %v1108_v61, 0.0  ;;  %v791_v63 = vpop.f32.mrb[10].mxu0 }
  0xf2   :  { %v1116_v1 = vadd.f32 %v791_v63, %v1051_v32  ;;  %v264_v2 = vpop.f32.mrb[11].mxu0  ;;  %423 = vrot.lane.b32.xlu1 %v360_v58, %s890_s1 }
  0xf3   :  { %v1122_v3 = vadd.f32 %v1051_v32, %v264_v2  ;;  %425 = vrot.lane.b32.xlu0 %v361_v62, %s890_s1 }
  0xf4   :  { %v364_v6 = vmax.f32 %v1116_v1, 0.0 }
  0xf5   :  { %v363_v4 = vmax.f32 %v1122_v3, 0.0  ;;  %v794_v5 = vpop.f32.mrb[12].mxu0 }
  0xf6   :  { %v1130_v7 = vadd.f32 %v794_v5, %v1051_v32  ;;  %v274_v8 = vpop.f32.mrb[13].mxu0  ;;  %427 = vrot.lane.b32.xlu1 %v362_v0, %s890_s1 }
  0xf7   :  { %v1136_v9 = vadd.f32 %v1051_v32, %v274_v8  ;;  %429 = vrot.lane.b32.xlu0 %v363_v4, %s890_s1 }
  0xf8   :  { %v366_v12 = vmax.f32 %v1130_v7, 0.0 }
  0xf9   :  { %v365_v10 = vmax.f32 %v1136_v9, 0.0  ;;  %v797_v11 = vpop.f32.mrb[14].mxu0 }
  0xfa   :  { %v1144_v13 = vadd.f32 %v797_v11, %v1051_v32  ;;  %v284_v14 = vpop.f32.mrb[15].mxu0  ;;  %431 = vrot.lane.b32.xlu1 %v364_v6, %s890_s1 }
  0xfb   :  { %v1150_v15 = vadd.f32 %v1051_v32, %v284_v14  ;;  %433 = vrot.lane.b32.xlu0 %v365_v10, %s890_s1 }
  0xfc   :  { %v368_v18 = vmax.f32 %v1144_v13, 0.0 }
  0xfd   :  { %v367_v16 = vmax.f32 %v1150_v15, 0.0  ;;  %v800_v17 = vpop.f32.mrb[16].mxu0 }
  0xfe   :  { %v1158_v19 = vadd.f32 %v800_v17, %v1051_v32  ;;  %v294_v20 = vpop.f32.mrb[17].mxu0  ;;  %435 = vrot.lane.b32.xlu1 %v366_v12, %s890_s1 }
  0xff   :  { %v1164_v21 = vadd.f32 %v1051_v32, %v294_v20  ;;  %437 = vrot.lane.b32.xlu0 %v367_v16, %s890_s1 }
 0x100   :  { %v370_v24 = vmax.f32 %v1158_v19, 0.0 }
 0x101   :  { %v369_v22 = vmax.f32 %v1164_v21, 0.0  ;;  %v803_v23 = vpop.f32.mrb[18].mxu0 }
 0x102   :  { %v1172_v25 = vadd.f32 %v803_v23, %v1051_v32  ;;  %v304_v26 = vpop.f32.mrb[19].mxu0  ;;  %439 = vrot.lane.b32.xlu1 %v368_v18, %s890_s1 }
 0x103   :  { %v1178_v27 = vadd.f32 %v1051_v32, %v304_v26  ;;  %441 = vrot.lane.b32.xlu0 %v369_v22, %s890_s1 }
 0x104   :  { %v372_v30 = vmax.f32 %v1172_v25, 0.0 }
 0x105   :  { %v371_v28 = vmax.f32 %v1178_v27, 0.0  ;;  %v806_v29 = vpop.f32.mrb[20].mxu0 }
 0x106   :  { %v1186_v31 = vadd.f32 %v806_v29, %v1051_v32  ;;  %v314_v33 = vpop.f32.mrb[21].mxu0  ;;  %443 = vrot.lane.b32.xlu1 %v370_v24, %s890_s1  ;;  %v578_v29 = vld [vmem:[%s1437_s5 + $0x8] sm:$0xff] }
 0x107   :  { %v1192_v34 = vadd.f32 %v1051_v32, %v314_v33  ;;  %445 = vrot.lane.b32.xlu0 %v371_v28, %s890_s1  ;;  %735 = vmatprep.mubr.msk.f32.mxu1 %vm581_vm1, %v578_v29 }
 0x108   :  { %v374_v45 = vmax.f32 %v1186_v31, 0.0 }
 0x109   :  { %v373_v39 = vmax.f32 %v1192_v34, 0.0  ;;  %v809_v41 = vpop.f32.mrb[22].mxu0 }
 0x10a   :  { %v1200_v47 = vadd.f32 %v809_v41, %v1051_v32  ;;  %v324_v51 = vpop.f32.mrb[23].mxu0  ;;  %447 = vrot.lane.b32.xlu1 %v372_v30, %s890_s1 }
 0x10b   :  { %v1206_v54 = vadd.f32 %v1051_v32, %v324_v51  ;;  %449 = vrot.lane.b32.xlu0 %v373_v39, %s890_s1 }
 0x10c   :  { %v1443_v63 = vmax.f32 %v1200_v47, 0.0  ;;  %v1444_v31 = vmax.f32 %v1200_v47, 0.0 }
 0x10d   :  { %v375_v57 = vmax.f32 %v1206_v54, 0.0  ;;  %v812_v60 = vpop.f32.mrb[24].mxu0 }
 0x10e   :  { %v1214_v2 = vadd.f32 %v812_v60, %v1051_v32  ;;  %v334_v5 = vpop.f32.mrb[25].mxu0  ;;  %451 = vrot.lane.b32.xlu1 %v374_v45, %s890_s1 }
 0x10f   :  { %v1220_v8 = vadd.f32 %v1051_v32, %v334_v5  ;;  %453 = vrot.lane.b32.xlu0 %v375_v57, %s890_s1  ;;  %v521_v5 = vld [vmem:[%s1436_s4] sm:$0xff] }
 0x110   :  { %v1441_v17 = vmax.f32 %v1214_v2, 0.0  ;;  %v1446_v47 = vmax.f32 %v1214_v2, 0.0 }
 0x111   :  { %v1442_v11 = vmax.f32 %v1220_v8, 0.0  ;;  %v815_v14 = vpop.f32.mrb[26].mxu0 }
 0x112   :  { %v1228_v20 = vadd.f32 %v815_v14, %v1051_v32  ;;  %v344_v23 = vpop.f32.mrb[27].mxu0  ;;  %455 = vrot.lane.b32.xlu1 %v1443_v63, %s890_s1  ;;  %v522_v14 = vld [vmem:[%s1436_s4 + $0x8] sm:$0xff] }
 0x113   :  { %v1234_v26 = vadd.f32 %v1051_v32, %v344_v23  ;;  %457 = vrot.lane.b32.xlu0 %v1442_v11, %s890_s1 }
 0x114   :  { %v1439_v41 = vmax.f32 %v1228_v20, 0.0  ;;  %v1448_v2 = vmax.f32 %v1228_v20, 0.0  ;;  %v579_v20 = vld [vmem:[%s1437_s5 + $0x10] sm:$0xff] }
 0x115   :  { %v1440_v33 = vmax.f32 %v1234_v26, 0.0 }
 0x116   :  { %459 = vrot.lane.b32.xlu1 %v1441_v17, %s890_s1 }
 0x117   :  { %461 = vrot.lane.b32.xlu0 %v1440_v33, %s890_s1 }
 0x11a   :  { %463 = vrot.lane.b32.xlu1 %v1439_v41, %s890_s1 }
 0x155   :  { %v410_v32 = vpop.permute.xlu0 %409 }
 0x156   :  { %v493_v51 = vmin.f32 %v353_v38, %v410_v32  ;;  %v523_v32 = vld [vmem:[%s1436_s4 + $0x10] sm:$0xff] }
 0x158   :  { %v416_v60 = vpop.permute.xlu1 %415  ;;  %v549_v33 = vmul.f32 %v521_v5, %v493_v51  ;;  %v526_v51 = vld [vmem:[%s1436_s4 + $0x28] sm:$0xff] }
 0x159   :  { %v412_v23 = vpop.permute.xlu0 %411  ;;  %v496_v41 = vmin.f32 %v356_v42, %v416_v60  ;;  %v525_v42 = vld [vmem:[%s1436_s4 + $0x20] sm:$0xff] }
 0x15a   :  { %v494_v29 = vmin.f32 %v354_v44, %v412_v23 }
 0x15b   :  { %v552_v44 = vmul.f32 %v524_v35, %v496_v41  ;;  %v530_v35 = vld [vmem:[%s1436_s4 + $0x48] sm:$0xff] }
 0x15c   :  { %v550_v38 = vmul.f32 %v522_v14, %v494_v29  ;;  %v414_v17 = vpop.permute.xlu1 %413  ;;  %v529_v29 = vld [vmem:[%s1436_s4 + $0x40] sm:$0xff] }
 0x15d   :  { %v495_v11 = vmin.f32 %v355_v49, %v414_v17  ;;  %v418_v63 = vpop.permute.xlu0 %417 }
 0x15e   :  { %v821_v37 = vpack.c.bf16 %v550_v38, %v549_v33  ;;  %v497_v40 = vmin.f32 %v357_v50, %v418_v63  ;;  %v527_v63 = vld [vmem:[%s1436_s4 + $0x30] sm:$0xff]  ;;  %v528_v33 = vld [vmem:[%s1436_s4 + $0x38] sm:$0xff] }
 0x15f   :  { %v551_v23 = vmul.f32 %v523_v32, %v495_v11 }
 0x160   :  { %v420_v60 = vpop.permute.xlu1 %419  ;;  %822 = vmatpush1.bf16.msra.mxu1 %v821_v37  ;;  %v553_v17 = vmul.f32 %v525_v42, %v497_v40 }
 0x161   :  { %v498_v43 = vmin.f32 %v358_v52, %v420_v60  ;;  %v422_v49 = vpop.permute.xlu0 %421  ;;  %823 = vmatprep.subr.bf16.mxu1 %v889_v36  ;;  %v824_v11 = vpack.c.bf16 %v552_v44, %v551_v23  ;;  %v531_v44 = vld [vmem:[%s1436_s4 + $0x50] sm:$0xff]  ;;  %v532_v23 = vld [vmem:[%s1436_s4 + $0x58] sm:$0xff]  ;;  %v533_v60 = vld [vmem:[%s1436_s4 + $0x60] sm:$0xff] }
 0x162   :  { %v499_v50 = vmin.f32 %v359_v56, %v422_v49 }
 0x163   :  { %v554_v48 = vmul.f32 %v526_v51, %v498_v43  ;;  %v534_v43 = vld [vmem:[%s1436_s4 + $0x68] sm:$0xff] }
 0x164   :  { %v424_v41 = vpop.permute.xlu1 %423  ;;  %825 = vmatpush1.bf16.msra.mxu1 %v824_v11  ;;  %v555_v14 = vmul.f32 %v527_v63, %v499_v50  ;;  %v536_v50 = vld [vmem:[%s1436_s4 + $0x78] sm:$0xff] }
 0x165   :  { %v500_v46 = vmin.f32 %v360_v58, %v424_v41  ;;  %v426_v52 = vpop.permute.xlu0 %425  ;;  %826 = vmatprep.subr.bf16.mxu1 %v889_v36  ;;  %v827_v5 = vpack.c.bf16 %v554_v48, %v553_v17  ;;  %v535_v48 = vld [vmem:[%s1436_s4 + $0x70] sm:$0xff] }
 0x166   :  { %v501_v56 = vmin.f32 %v361_v62, %v426_v52  ;;  %v538_v52 = vld [vmem:[%s1436_s4 + $0x88] sm:$0xff] }
 0x167   :  { %v556_v55 = vmul.f32 %v528_v33, %v500_v46  ;;  %v537_v46 = vld [vmem:[%s1436_s4 + $0x80] sm:$0xff] }
 0x168   :  { %v428_v38 = vpop.permute.xlu1 %427  ;;  %828 = vmatpush1.bf16.msra.mxu1 %v827_v5  ;;  %v557_v37 = vmul.f32 %v529_v29, %v501_v56  ;;  %v539_v56 = vld [vmem:[%s1436_s4 + $0x90] sm:$0xff]  ;;  %v540_v29 = vld [vmem:[%s1436_s4 + $0x98] sm:$0xff] }
 0x169   :  { %v502_v53 = vmin.f32 %v362_v0, %v428_v38  ;;  %v430_v58 = vpop.permute.xlu0 %429  ;;  %829 = vmatprep.subr.bf16.mxu1 %v889_v36  ;;  %v830_v32 = vpack.c.bf16 %v556_v55, %v555_v14 }
 0x16a   :  { %v503_v62 = vmin.f32 %v363_v4, %v430_v58  ;;  %v541_v58 = vld [vmem:[%s1436_s4 + $0xa0] sm:$0xff] }
 0x16b   :  { %v558_v61 = vmul.f32 %v530_v35, %v502_v53 }
 0x16c   :  { %v432_v40 = vpop.permute.xlu1 %431  ;;  %831 = vmatpush1.bf16.msra.mxu1 %v830_v32  ;;  %v559_v51 = vmul.f32 %v531_v44, %v503_v62  ;;  %v542_v32 = vld [vmem:[%s1436_s4 + $0xa8] sm:$0xff]  ;;  %v543_v44 = vld [vmem:[%s1436_s4 + $0xb0] sm:$0xff] }
 0x16d   :  { %v504_v59 = vmin.f32 %v364_v6, %v432_v40  ;;  %v434_v0 = vpop.permute.xlu0 %433  ;;  %832 = vmatprep.subr.bf16.mxu1 %v889_v36  ;;  %v833_v42 = vpack.c.bf16 %v558_v61, %v557_v37 }
 0x16e   :  { %v505_v4 = vmin.f32 %v365_v10, %v434_v0 }
 0x16f   :  { %v560_v3 = vmul.f32 %v532_v23, %v504_v59  ;;  %v544_v23 = vld [vmem:[%s1436_s4 + $0xb8] sm:$0xff] }
 0x170   :  { %v436_v49 = vpop.permute.xlu1 %435  ;;  %834 = vmatpush1.bf16.msra.mxu1 %v833_v42  ;;  %v561_v17 = vmul.f32 %v533_v60, %v505_v4  ;;  %v546_v4 = vld [vmem:[%s1436_s4 + $0xc8] sm:$0xff] }
 0x171   :  { %v506_v1 = vmin.f32 %v366_v12, %v436_v49  ;;  %v438_v6 = vpop.permute.xlu0 %437  ;;  %835 = vmatprep.subr.bf16.mxu1 %v889_v36  ;;  %v836_v11 = vpack.c.bf16 %v560_v3, %v559_v51  ;;  %v545_v3 = vld [vmem:[%s1436_s4 + $0xc0] sm:$0xff] }
 0x172   :  { %v507_v10 = vmin.f32 %v367_v16, %v438_v6 }
 0x173   :  { %v562_v9 = vmul.f32 %v534_v43, %v506_v1 }
 0x174   :  { %v440_v63 = vpop.permute.xlu1 %439  ;;  %837 = vmatpush1.bf16.msra.mxu1 %v836_v11  ;;  %v563_v41 = vmul.f32 %v535_v48, %v507_v10  ;;  %v1447_v11 = vmax.f32 %v1234_v26, 0.0  ;;  %v548_v10 = vld [vmem:[%s1436_s4 + $0xd8] sm:$0xff] }
 0x175   :  { %v508_v7 = vmin.f32 %v368_v18, %v440_v63  ;;  %v442_v12 = vpop.permute.xlu0 %441  ;;  %838 = vmatprep.subr.bf16.mxu1 %v889_v36  ;;  %v839_v33 = vpack.c.bf16 %v562_v9, %v561_v17  ;;  %v547_v9 = vld [vmem:[%s1436_s4 + $0xd0] sm:$0xff] }
 0x176   :  { %v509_v16 = vmin.f32 %v369_v22, %v442_v12 }
 0x177   :  { %v564_v15 = vmul.f32 %v536_v50, %v508_v7 }
 0x178   :  { %v444_v5 = vpop.permute.xlu1 %443  ;;  %840 = vmatpush1.bf16.msra.mxu1 %v839_v33  ;;  %v565_v55 = vmul.f32 %v537_v46, %v509_v16  ;;  %v577_v33 = vld [vmem:[%s1437_s5] sm:$0xff] }
 0x179   :  { %v510_v13 = vmin.f32 %v370_v24, %v444_v5  ;;  %v446_v18 = vpop.permute.xlu0 %445  ;;  %841 = vmatprep.subr.bf16.mxu1 %v889_v36  ;;  %v842_v14 = vpack.c.bf16 %v564_v15, %v563_v41  ;;  %v580_v41 = vld [vmem:[%s1437_s5 + $0x18] sm:$0xff]  ;;  %s891_s5 = smov [#allocation3]  }
 0x17a   :  { %v511_v22 = vmin.f32 %v371_v28, %v446_v18  ;;  %s698_s20 = sshll.u32 %s891_s5, 4  ;;  %s699_s20 = int_to_ptr.vmem [resolvable:$true] %s698_s20 }
 0x17b   :  { %v566_v21 = vmul.f32 %v538_v52, %v510_v13  ;;  %v676_v13 = vlaneseq  ;;  %s865_s21 = scalar_lea.vmem %s699_s20, 16  ;;  %s869_s22 = scalar_lea.vmem %s699_s20, 32 }
 0x17c   :  { %v448_v35 = vpop.permute.xlu1 %447  ;;  %843 = vmatpush1.bf16.msra.mxu1 %v842_v14  ;;  %v567_v53 = vmul.f32 %v539_v56, %v511_v22  ;;  %p866_p0 = scmp.ne.s32.totalorder %s699_s20, %s865_s21  ;;  %p870_p1 = scmp.lt.s32.totalorder %s699_s20, %s699_s20 }
 0x17d   :  { %v512_v19 = vmin.f32 %v372_v30, %v448_v35  ;;  %v450_v24 = vpop.permute.xlu0 %449  ;;  %844 = vmatprep.subr.bf16.mxu1 %v889_v36  ;;  %v845_v38 = vpack.c.bf16 %v566_v21, %v565_v55  ;;  %v677_v18 = vand.u32 127, %v676_v13  ;;  %v679_v14 = vshrl.u32 %v676_v13, 7  ;;  %p871_p2 = scmp.lt.s32.totalorder %s869_s22, %s865_s21 }
 0x17e   :  { %v513_v28 = vmin.f32 %v373_v39, %v450_v24  ;;  %v671_v21 = vstv %s1432_s0 }
 0x17f   :  { %v568_v27 = vmul.f32 %v540_v29, %v512_v19  ;;  %v682_v55 = vadd.s32 4294967288, %v677_v18  ;;  %v680_v56 = vsub.s32 %v677_v18, %v679_v14  ;;  %p872_p3 = por %p871_p2, %p870_p1 }
 0x180   :  { %v452_v37 = vpop.permute.xlu1 %451  ;;  %846 = vmatpush1.bf16.msra.mxu1 %v845_v38  ;;  %v569_v62 = vmul.f32 %v541_v58, %v513_v28 }
 0x181   :  { %v514_v25 = vmin.f32 %v374_v45, %v452_v37  ;;  %v454_v30 = vpop.permute.xlu0 %453  ;;  %847 = vmatprep.subr.bf16.mxu1 %v889_v36  ;;  %v848_v61 = vpack.c.bf16 %v568_v27, %v567_v53  ;;  %v685_v35 = vsub.s32 %v682_v55, %v679_v14  ;;  %p873_p4 = pnand %p872_p3, %p866_p0 }
 0x182   :  { %v515_v39 = vmin.f32 %v375_v57, %v454_v30  ;;  %v1445_v57 = vmax.f32 %v1220_v8, 0.0 }
 0x183   :  { %v570_v34 = vmul.f32 %v542_v32, %v514_v25 }
 0x184   :  { %v456_v40 = vpop.permute.xlu1 %455  ;;  %849 = vmatpush1.bf16.msra.mxu1 %v848_v61  ;;  %v571_v42 = vmul.f32 %v543_v44, %v515_v39 }
 0x185   :  { %v516_v45 = vmin.f32 %v1444_v31, %v456_v40  ;;  %v458_v59 = vpop.permute.xlu0 %457  ;;  %850 = vmatprep.subr.bf16.mxu1 %v889_v36  ;;  %v851_v0 = vpack.c.bf16 %v570_v34, %v569_v62 }
 0x186   :  { %v517_v51 = vmin.f32 %v1445_v57, %v458_v59 }
 0x187   :  { %v572_v54 = vmul.f32 %v544_v23, %v516_v45 }
 0x188   :  { %v460_v60 = vpop.permute.xlu1 %459  ;;  %852 = vmatpush1.bf16.msra.mxu1 %v851_v0  ;;  %v573_v6 = vmul.f32 %v545_v3, %v517_v51 }
 0x189   :  { %v518_v43 = vmin.f32 %v1446_v47, %v460_v60  ;;  %v462_v49 = vpop.permute.xlu0 %461  ;;  %853 = vmatprep.subr.bf16.mxu1 %v889_v36  ;;  %v854_v1 = vpack.c.bf16 %v572_v54, %v571_v42 }
 0x18a   :  { %v519_v17 = vmin.f32 %v1447_v11, %v462_v49 }
 0x18b   :  { %v574_v8 = vmul.f32 %v546_v4, %v518_v43 }
 0x18c   :  { %v464_v48 = vpop.permute.xlu1 %463  ;;  %855 = vmatpush1.bf16.msra.mxu1 %v854_v1  ;;  %v575_v7 = vmul.f32 %v547_v9, %v519_v17 }
 0x18d   :  { %v520_v50 = vmin.f32 %v1448_v2, %v464_v48  ;;  %856 = vmatprep.subr.bf16.mxu1 %v889_v36  ;;  %v857_v63 = vpack.c.bf16 %v574_v8, %v573_v6 }
 0x18f   :  { %v576_v12 = vmul.f32 %v548_v10, %v520_v50 }
 0x190   :  { %858 = vmatpush1.bf16.msra.mxu1 %v857_v63 }
 0x191   :  { %859 = vmatprep.subr.bf16.mxu1 %v889_v36  ;;  %v860_v26 = vpack.c.bf16 %v576_v12, %v575_v7 }
 0x194   :  { %861 = vmatpush1.bf16.msra.mxu1 %v860_v26 }
 0x197   :  { %653 = vmatmul.mubr.f32.vlgmr.msra.gmra.mrb[0].mxu1 %v577_v33 }
 0x198   :  { %736 = vmatprep.mubr.msk.f32.mxu1 %vm581_vm1, %v580_v41 }
 0x19b   :  { %658 = vmatmul.mubr.f32.gmra.mrb[2].mxu1 %v579_v20 }
 0x26a   :  { %v654_v36 = vpop.f32.mrb[0].mxu1 }
 0x26b   :  { %v656_v15 = vpop.f32.mrb[1].mxu1  ;;  %v664_v16 = vsel %vm663_vm2, %v654_v36, 0.0 }
 0x26c   :  { %665 = vadd.xlane.f32.xlu0 %v664_v16 }
 0x26e   :  { %v659_v46 = vpop.f32.mrb[2].mxu1 }
 0x26f   :  { %v661_v52 = vpop.f32.mrb[3].mxu1  ;;  %v667_v5 = vsel %vm663_vm2, %v659_v46, 0.0 }
 0x270   :  { %668 = vadd.xlane.f32.xlu1 %v667_v5 }
 0x2f9   :  { %v666_v22 = vpop.xlane.xlu0 %665 }
 0x2fa   :  { %v672_v29 = vadd.f32 %v671_v21, %v666_v22 }
 0x2fc   :  { %v681_v38 = vrot.slane %v672_v29, %v680_v56 }
 0x2fd   :  { %v669_v19 = vpop.xlane.xlu1 %668 }
 0x2fe   :  { %v673_v24 = vadd.f32 %v671_v21, %v669_v19 }
 0x300   :  { %v686_v53 = vrot.slane %v673_v24, %v685_v35 }
 0x302   :  { %v688_v27 = vsel %vm687_vm3, %v686_v53, %v681_v38 }
 0x303   :  { %691 = vst.msk [vmem:[#allocation3] sm:$0x1] %vm690_vm4, %v688_v27 }
 0x304   :  { %876 = shalt.err (!%p873_p4)
}
 0x305   :  { %s877_s24 = scalar_lea.hbm %s1438_s6, 16 }
 0x306   :  { %p878_p5 = scmp.ne.s32.totalorder %s1438_s6, %s877_s24  ;;  %p881_p6 = scmp.lt.u32.totalorder %s877_s24, %s1438_s6 }
 0x308   :  { %p883_p7 = pnand %p881_p6, %p878_p5 }
 0x30a   :  { %886 = shalt.err (!%p883_p7)
}
 0x30b   :  { %701 = dma.vmem_to_hbm [thread:$0]  %s699_s20, 16, %s1438_s6, [#allocation4]  }
 0x30c   :  { %887 = dma.done.wait [#allocation4], 16  }
 0x30d   :  { %888 = vsyncadd [#allocation4], 4294967280 }
 0x30e   :  { %705 = vsyncpa [#allocation4], 1 }

</bundles_post_ra>
